<compile_context>
chip_gen: v7x
topology: tpu7x:2x2x1
jax: 0.10.0
libtpu: 0.0.40
codegen_flags: <defaults>
</compile_context>

<pallas_src>
import functools

import numpy as np
import jax
import jax.numpy as jnp
from jax.experimental import pallas as pl
from jax.experimental.pallas import tpu as pltpu


def _vmem_capacity_bytes():
    """Physical VMEM per core; conservative (v7x-sized) fallback."""
    try:
        info = pltpu.get_tpu_info()
        for attr in ("vmem_capacity_bytes", "vmem_size_bytes", "vmem_bytes"):
            v = getattr(info, attr, None)
            if v:
                return int(v)
    except Exception:
        pass
    return 64 * 1024 * 1024


def _selection_weights(H, W, dtype):
    """(HW, P) compaction / averaging matrices for 2x2 stride-2 windows.

    Column p = i*(W//2) + j:
      cmax: 1.0 at the window's top-left source position (one-hot pick).
      savg: 0.25 at all four source positions of the window (window mean).
    Built once on the host; 1.0 and 0.25 are exact in both f32 and bf16.
    """
    Hh, Wh = H // 2, W // 2
    HW, P = H * W, Hh * Wh
    src = np.arange(HW, dtype=np.int64)[:, None]
    dst = np.arange(P, dtype=np.int64)[None, :]
    oi, oj = dst // Wh, dst % Wh
    base = (2 * oi) * W + 2 * oj
    cmax = (src == base).astype(np.float32)
    hit = ((src == base) | (src == base + 1) |
           (src == base + W) | (src == base + W + 1))
    savg = hit.astype(np.float32) * 0.25
    return jnp.asarray(cmax, dtype=dtype), jnp.asarray(savg, dtype=dtype)


def _choose_block_rows(B, HW, P, itemsize, compute_itemsize, vmem_cap):
    """Images (rows) per grid step, budgeted against VMEM (no 128-row floor)."""
    per_row = (2 * HW * itemsize              # input block, double-buffered
               + 5 * HW * compute_itemsize    # shifted copies / window max / staging
               + 2 * (2 * P + 1) * itemsize)  # max/avg/gap outputs, double-buffered
    weight_bytes = 2 * HW * P * compute_itemsize * 2   # resident C / S (+ buffering)
    budget = int(vmem_cap * 0.45) - weight_bytes
    max_rows = max(8, budget // per_row)
    max_rows = max(8, (max_rows // 8) * 8)

    if B <= max_rows:
        # Whole batch fits in one block.  Split it in two when we can do so
        # cleanly so the "parallel" grid axis can use both v7x TensorCores.
        if B >= 16 and B % 16 == 0:
            return B // 2
        return B
    # Several blocks needed: prefer a multiple-of-8 divisor of B (no padding).
    for tb in range(max_rows, 7, -8):
        if B % tb == 0:
            return tb
    return max_rows            # rare ragged case; wrapper pads the remainder


def _pooling_kernel(cmax_ref, savg_ref, x_ref, max_ref, avg_ref, gap_ref,
                    *, W, inv_windows):
    """One grid step over a (TB, H*W) slab of flattened images."""
    x = x_ref[...]                               # (TB, HW), native dtype

    # MaxPool2d(2,2): lane-shift the three window neighbours on top of the
    # top-left tap (XLU), combine on the VPU.  Wrapped values never land on a
    # window's top-left position and are zeroed by the one-hot pick below.
    x01 = jnp.roll(x, -1, axis=1)                # (i,   j+1)
    x10 = jnp.roll(x, -W, axis=1)                # (i+1, j  )
    x11 = jnp.roll(x10, -1, axis=1)              # (i+1, j+1)
    m = jnp.maximum(jnp.maximum(x, x01), jnp.maximum(x10, x11))

    # Compaction / averaging on the MXU (weights are resident constants):
    #   maxes[b, p] = m[b, base(p)]              (one-hot pick, exact)
    #   avgs [b, p] = 0.25 * (sum of the 4 taps) (pre-scaled selection)
    maxes = jnp.dot(m, cmax_ref[...], preferred_element_type=jnp.float32)
    avgs = jnp.dot(x, savg_ref[...], preferred_element_type=jnp.float32)

    max_ref[...] = maxes.astype(max_ref.dtype)
    avg_ref[...] = avgs.astype(avg_ref.dtype)

    # AdaptiveAvgPool2d((1,1)): the windows tile the image exactly, so the
    # global mean is the mean of the window means.  The (TB, 1) block costs a
    # few masked single-lane stores per step — negligible vs. the input loads.
    gap = jnp.sum(avgs, axis=1, keepdims=True) * inv_windows
    gap_ref[...] = gap.astype(gap_ref.dtype)


def _pooling_comparison_impl(x):
    """x: (N, C, H, W) -> (max_out, avg_out, adaptive_out), PyTorch semantics."""
    N, C, H, W = x.shape
    assert H % 2 == 0 and W % 2 == 0, "2x2 / stride-2 pooling needs even H, W"
    Hh, Wh = H // 2, W // 2
    HW, P = H * W, Hh * Wh
    B = N * C

    if HW > 64 * 64:
        # TODO(synk): for large spatial dims switch to a two-stage row-pair /
        # column-pair variant ((W, W/2) compaction matmul + sublane combine);
        # the (HW, P) selection matrices below scale as O(HW^2).
        raise NotImplementedError("pooling_comparison: H*W > 4096 not supported")

    if x.dtype in (jnp.float32, jnp.bfloat16):
        compute_dtype = x.dtype
    else:
        compute_dtype = jnp.float32
        x = x.astype(jnp.float32)

    itemsize = jnp.dtype(x.dtype).itemsize
    cdsize = jnp.dtype(compute_dtype).itemsize
    vmem_cap = _vmem_capacity_bytes()
    TB = _choose_block_rows(B, HW, P, itemsize, cdsize, vmem_cap)
    num_blocks = -(-B // TB)
    Bp = num_blocks * TB

    x2 = x.reshape(B, HW)                  # free reshape: one image per row
    if Bp != B:                            # rare: B has no clean mult-of-8 divisor
        x2 = jnp.pad(x2, ((0, Bp - B), (0, 0)))

    cmax, savg = _selection_weights(H, W, compute_dtype)
    kernel = functools.partial(_pooling_kernel, W=W, inv_windows=1.0 / P)

    # Generation-aware VMEM limit: ~90 MiB on v5e/v6e (128 MiB), ~45 MiB on v7x.
    vmem_limit = max(32 * 1024 * 1024, min(int(vmem_cap * 0.7), 96 * 1024 * 1024))

    max_o, avg_o, gap_o = pl.pallas_call(
        kernel,
        out_shape=(
            jax.ShapeDtypeStruct((Bp, P), x.dtype),
            jax.ShapeDtypeStruct((Bp, P), x.dtype),
            jax.ShapeDtypeStruct((Bp, 1), x.dtype),
        ),
        grid_spec=pltpu.PrefetchScalarGridSpec(
            num_scalar_prefetch=0,
            grid=(num_blocks,),
            in_specs=[
                pl.BlockSpec((HW, P), lambda b: (0, 0)),    # cmax: resident weight
                pl.BlockSpec((HW, P), lambda b: (0, 0)),    # savg: resident weight
                pl.BlockSpec((TB, HW), lambda b: (b, 0)),   # input slab
            ],
            out_specs=[
                pl.BlockSpec((TB, P), lambda b: (b, 0)),
                pl.BlockSpec((TB, P), lambda b: (b, 0)),
                pl.BlockSpec((TB, 1), lambda b: (b, 0)),
            ],
        ),
        compiler_params=pltpu.CompilerParams(
            dimension_semantics=("parallel",),
            vmem_limit_bytes=vmem_limit,
        ),
    )(cmax, savg, x2)

    if Bp != B:
        max_o, avg_o, gap_o = max_o[:B], avg_o[:B], gap_o[:B]

    max_out = max_o.reshape(N, C, Hh, Wh)
    avg_out = avg_o.reshape(N, C, Hh, Wh)
    gap_out = gap_o.reshape(N, C, 1, 1)
    return max_out, avg_out, gap_out


pooling_comparison = jax.jit(_pooling_comparison_impl)


if __name__ == "__main__":
    key = jax.random.PRNGKey(0)
    N, C, H, W = 2, 4, 16, 16
    x = jax.random.normal(key, (N, C, H, W), dtype=jnp.float32)

    max_out, avg_out, adaptive_out = pooling_comparison(x)
    jax.block_until_ready((max_out, avg_out, adaptive_out))

    # Pure-JAX reference (same semantics as the PyTorch module).
    xw = x.reshape(N, C, H // 2, 2, W // 2, 2)
    ref_max = jnp.max(xw, axis=(3, 5))
    ref_avg = jnp.mean(xw, axis=(3, 5))
    ref_gap = jnp.mean(x, axis=(2, 3), keepdims=True)

    assert max_out.shape == (N, C, H // 2, W // 2)
    assert avg_out.shape == (N, C, H // 2, W // 2)
    assert adaptive_out.shape == (N, C, 1, 1)
    assert jnp.allclose(max_out, ref_max, atol=1e-4, rtol=1e-4)
    assert jnp.allclose(avg_out, ref_avg, atol=1e-4, rtol=1e-4)
    assert jnp.allclose(adaptive_out, ref_gap, atol=1e-4, rtol=1e-4)

    print("KERNEL_OK")
</pallas_src>

<mosaic_0001>
module attributes {stable_mosaic.version = 11 : i64} {
  func.func @_pooling_kernel(%arg0: i32, %arg1: memref<256x64xf32, #tpu.memory_space<vmem>>, %arg2: memref<256x64xf32, #tpu.memory_space<vmem>>, %arg3: memref<8x256xf32, #tpu.memory_space<vmem>>, %arg4: memref<8x64xf32, #tpu.memory_space<vmem>>, %arg5: memref<8x64xf32, #tpu.memory_space<vmem>>, %arg6: memref<8x1xf32, #tpu.memory_space<vmem>>) attributes {dimension_semantics = [#tpu.dimension_semantics<parallel>], iteration_bounds = array<i64: 1>, scalar_prefetch = 0 : i64, scratch_operands = 0 : i64, tpu.core_type = #tpu.core_type<tc>, window_params = [{pipeline_mode = #tpu.pipeline_mode<synchronous>, transform_indices = @transform_0, window_bounds = array<i64: 256, 64>}, {pipeline_mode = #tpu.pipeline_mode<synchronous>, transform_indices = @transform_1, window_bounds = array<i64: 256, 64>}, {transform_indices = @transform_2, window_bounds = array<i64: 8, 256>}, {transform_indices = @transform_3, window_bounds = array<i64: 8, 64>}, {transform_indices = @transform_4, window_bounds = array<i64: 8, 64>}, {transform_indices = @transform_5, window_bounds = array<i64: 8, 1>}]} {
    %c0 = arith.constant 0 : index
    %c0_0 = arith.constant 0 : index
    %0 = vector.load %arg3[%c0, %c0_0] : memref<8x256xf32, #tpu.memory_space<vmem>>, vector<8x256xf32>
    %1 = vector.extract_strided_slice %0 {offsets = [0, 1], sizes = [8, 255], strides = [1, 1]} : vector<8x256xf32> to vector<8x255xf32>
    %2 = vector.extract_strided_slice %0 {offsets = [0, 0], sizes = [8, 1], strides = [1, 1]} : vector<8x256xf32> to vector<8x1xf32>
    %3 = tpu.concatenate %1, %2 in 1 : vector<8x255xf32>, vector<8x1xf32> -> vector<8x256xf32>
    %4 = vector.extract_strided_slice %0 {offsets = [0, 16], sizes = [8, 240], strides = [1, 1]} : vector<8x256xf32> to vector<8x240xf32>
    %5 = vector.extract_strided_slice %0 {offsets = [0, 0], sizes = [8, 16], strides = [1, 1]} : vector<8x256xf32> to vector<8x16xf32>
    %6 = tpu.concatenate %4, %5 in 1 : vector<8x240xf32>, vector<8x16xf32> -> vector<8x256xf32>
    %7 = vector.extract_strided_slice %6 {offsets = [0, 1], sizes = [8, 255], strides = [1, 1]} : vector<8x256xf32> to vector<8x255xf32>
    %8 = vector.extract_strided_slice %6 {offsets = [0, 0], sizes = [8, 1], strides = [1, 1]} : vector<8x256xf32> to vector<8x1xf32>
    %9 = tpu.concatenate %7, %8 in 1 : vector<8x255xf32>, vector<8x1xf32> -> vector<8x256xf32>
    %10 = arith.maximumf %0, %3 : vector<8x256xf32>
    %11 = arith.maximumf %6, %9 : vector<8x256xf32>
    %12 = arith.maximumf %10, %11 : vector<8x256xf32>
    %c0_1 = arith.constant 0 : index
    %c0_2 = arith.constant 0 : index
    %13 = vector.load %arg1[%c0_1, %c0_2] : memref<256x64xf32, #tpu.memory_space<vmem>>, vector<256x64xf32>
    %cst = arith.constant dense<0.000000e+00> : vector<8x64xf32>
    %14 = tpu.matmul %12, %13, %cst {dimension_numbers = #tpu.dot_dimension_numbers<[1], [0], [0], [1], [0, 0, 1, 1], [], []>} : vector<8x256xf32>, vector<256x64xf32>, vector<8x64xf32> -> vector<8x64xf32>
    %c0_3 = arith.constant 0 : index
    %c0_4 = arith.constant 0 : index
    %15 = vector.load %arg2[%c0_3, %c0_4] : memref<256x64xf32, #tpu.memory_space<vmem>>, vector<256x64xf32>
    %cst_5 = arith.constant dense<0.000000e+00> : vector<8x64xf32>
    %16 = tpu.matmul %0, %15, %cst_5 {dimension_numbers = #tpu.dot_dimension_numbers<[1], [0], [0], [1], [0, 0, 1, 1], [], []>} : vector<8x256xf32>, vector<256x64xf32>, vector<8x64xf32> -> vector<8x64xf32>
    %c0_6 = arith.constant 0 : index
    %c0_7 = arith.constant 0 : index
    %17 = vector.load %arg4[%c0_6, %c0_7] : memref<8x64xf32, #tpu.memory_space<vmem>>, vector<8x64xf32>
    tpu.vector_store %arg4[%c0_6, %c0_7], %14 {strides = array<i32>} : memref<8x64xf32, #tpu.memory_space<vmem>>, vector<8x64xf32>,
    %c0_8 = arith.constant 0 : index
    %c0_9 = arith.constant 0 : index
    %18 = vector.load %arg5[%c0_8, %c0_9] : memref<8x64xf32, #tpu.memory_space<vmem>>, vector<8x64xf32>
    tpu.vector_store %arg5[%c0_8, %c0_9], %16 {strides = array<i32>} : memref<8x64xf32, #tpu.memory_space<vmem>>, vector<8x64xf32>,
    %cst_10 = arith.constant dense<0.000000e+00> : vector<8xf32>
    %19 = vector.multi_reduction <add>, %16, %cst_10 [1] : vector<8x64xf32> to vector<8xf32>
    %20 = vector.shape_cast %19 : vector<8xf32> to vector<8x1xf32>
    %cst_11 = arith.constant 1.562500e-02 : f32
    %21 = vector.broadcast %cst_11 : f32 to vector<8x1xf32>
    %22 = arith.mulf %20, %21 : vector<8x1xf32>
    %c0_12 = arith.constant 0 : index
    %c0_13 = arith.constant 0 : index
    %23 = vector.load %arg6[%c0_12, %c0_13] : memref<8x1xf32, #tpu.memory_space<vmem>>, vector<8x1xf32>
    tpu.vector_store %arg6[%c0_12, %c0_13], %22 {strides = array<i32>} : memref<8x1xf32, #tpu.memory_space<vmem>>, vector<8x1xf32>,
    return
  }
  func.func @transform_0(%arg0: i32) -> (i32, i32) {
    %c0_i32 = arith.constant 0 : i32
    %c0_i32_0 = arith.constant 0 : i32
    %c0_i32_1 = arith.constant 0 : i32
    return %c0_i32, %c0_i32_0 : i32, i32
  }
  func.func @transform_1(%arg0: i32) -> (i32, i32) {
    %c0_i32 = arith.constant 0 : i32
    %c0_i32_0 = arith.constant 0 : i32
    %c0_i32_1 = arith.constant 0 : i32
    return %c0_i32, %c0_i32_0 : i32, i32
  }
  func.func @transform_2(%arg0: i32) -> (i32, i32) {
    %c0_i32 = arith.constant 0 : i32
    %c0_i32_0 = arith.constant 0 : i32
    return %arg0, %c0_i32 : i32, i32
  }
  func.func @transform_3(%arg0: i32) -> (i32, i32) {
    %c0_i32 = arith.constant 0 : i32
    %c0_i32_0 = arith.constant 0 : i32
    return %arg0, %c0_i32 : i32, i32
  }
  func.func @transform_4(%arg0: i32) -> (i32, i32) {
    %c0_i32 = arith.constant 0 : i32
    %c0_i32_0 = arith.constant 0 : i32
    return %arg0, %c0_i32 : i32, i32
  }
  func.func @transform_5(%arg0: i32) -> (i32, i32) {
    %c0_i32 = arith.constant 0 : i32
    %c0_i32_0 = arith.constant 0 : i32
    return %arg0, %c0_i32 : i32, i32
  }
}

</mosaic_0001>

<bundles_post_ra>
// kernel: _pooling_comparison_impl.1
= control target key start
LH: loop header
LB: loop body
LE: loop exit
PB: predicated region body
PF: predicated region fallthrough
CT: control target
= control target key end

     0   :  { %11 = vsyncpa [#allocation3], 0  ;;  %s602_s0 = inlined_call_operand.hbm [shape: f32[256,64], index: 0, kind: input, shape index: {}]   ;;  %s603_s1 = inlined_call_operand.hbm [shape: f32[256,64], index: 1, kind: input, shape index: {}]   ;;  %s604_s2 = inlined_call_operand.vmem [shape: f32[8,256], index: 2, kind: input, shape index: {}]   ;;  %s605_s3 = inlined_call_operand.vmem [shape: f32[8,64], index: 3, kind: output, shape index: {0}]   ;;  %s606_s4 = inlined_call_operand.vmem [shape: f32[8,64], index: 4, kind: output, shape index: {1}]   ;;  %s607_s5 = inlined_call_operand.vmem [shape: f32[8,1], index: 5, kind: output, shape index: {2}]  }
   0x1   :  { %12 = vsyncpa [#allocation5], 0  ;;  %s515_s18 = smov [#allocation2]   ;;  %s467_s22 = scalar_lea.hbm %s602_s0, 4096 }
   0x2   :  { %s18_s19 = sshll.u32 %s515_s18, 4  ;;  %p468_p0 = scmp.ne.s32.totalorder %s602_s0, %s467_s22  ;;  %s19_s19 = int_to_ptr.vmem [resolvable:$true] %s18_s19 }
   0x3   :  { %p471_p1 = scmp.lt.u32.totalorder %s467_s22, %s602_s0 }
   0x5   :  { %p473_p2 = pnand %p471_p1, %p468_p0 }
   0x7   :  { %476 = shalt.err (!%p473_p2)
}
   0x8   :  { %s477_s27 = scalar_lea.vmem %s19_s19, 4096  ;;  %p482_p4 = scmp.lt.s32.totalorder %s19_s19, %s19_s19 }
   0x9   :  { %p478_p3 = scmp.ne.s32.totalorder %s19_s19, %s477_s27  ;;  %p483_p5 = scmp.lt.s32.totalorder %s477_s27, %s477_s27 }
   0xb   :  { %p484_p6 = por %p483_p5, %p482_p4 }
   0xd   :  { %p485_p7 = pnand %p484_p6, %p478_p3 }
   0xf   :  { %488 = shalt.err (!%p485_p7)
}
  0x10   :  { %s516_s28 = smov 128   ;;  %s517_s29 = smov 8  }
  0x11   :  { %24 = dma.hbm_to_vmem [thread:$0]  %s602_s0, 4096, %s19_s19, [#allocation3], %s516_s28, %s516_s28, %s517_s29  }
  0x12   :  { %s518_s7 = smov [#allocation4]   ;;  %s489_s11 = scalar_lea.hbm %s603_s1, 4096 }
  0x13   :  { %s30_s8 = sshll.u32 %s518_s7, 4  ;;  %p490_p8 = scmp.ne.s32.totalorder %s603_s1, %s489_s11  ;;  %s31_s8 = int_to_ptr.vmem [resolvable:$true] %s30_s8 }
  0x14   :  { %p493_p9 = scmp.lt.u32.totalorder %s489_s11, %s603_s1 }
  0x16   :  { %p495_p10 = pnand %p493_p9, %p490_p8 }
  0x18   :  { %498 = shalt.err (!%p495_p10)
}
  0x19   :  { %s499_s16 = scalar_lea.vmem %s31_s8, 4096  ;;  %p504_p12 = scmp.lt.s32.totalorder %s31_s8, %s31_s8 }
  0x1a   :  { %p500_p11 = scmp.ne.s32.totalorder %s31_s8, %s499_s16  ;;  %p505_p13 = scmp.lt.s32.totalorder %s499_s16, %s499_s16 }
  0x1c   :  { %p506_p0 = por %p505_p13, %p504_p12 }
  0x1e   :  { %p507_p1 = pnand %p506_p0, %p500_p11 }
  0x20   :  { %510 = shalt.err (!%p507_p1)
}
  0x21   :  { %36 = dma.hbm_to_vmem [thread:$0]  %s603_s1, 4096, %s31_s8, [#allocation5], %s516_s28, %s516_s28, %s517_s29  }
  0x22   :  { %511 = dma.done.wait [#allocation3], 4096  }
  0x23   :  { %512 = vsyncadd [#allocation3], 4294963200 }
  0x24   :  { %513 = dma.done.wait [#allocation5], 4096  }
  0x25   :  { %514 = vsyncadd [#allocation5], 4294963200  ;;  %v578_v0 = vld [vmem:[%s604_s2] sm:$0xff]  ;;  %v583_v1 = vld [vmem:[%s604_s2 + $0x8] sm:$0xff]  ;;  %s519_s1 = smov 112   ;;  %s520_s2 = smov 127  }
  0x26   :  { %v203_v2 = vld [vmem:[#allocation4 + $0x80] sm:$0xff]  ;;  %v452_v3 = vpack.i.bf16 %v583_v1, %v578_v0  ;;  %v204_v4 = vld [vmem:[#allocation4 + $0x88] sm:$0xff]  ;;  %283 = vmatprep.mubr.f32.mxu1 %v583_v1  ;;  %v205_v9 = vld [vmem:[#allocation4 + $0x90] sm:$0xff]  ;;  %vm63_vm0 = vcmask 916480   ;;  %vm53_vm1 = vcmask 1039360   ;;  %vm289_vm2 = vcmask 523264  }
  0x27   :  { %v187_v5 = vld [vmem:[#allocation4] sm:$0xff]  ;;  %v188_v6 = vld [vmem:[#allocation4 + $0x8] sm:$0xff]  ;;  %v414_v7 = vpack.c.bf16 %v204_v4, %v203_v2  ;;  %v206_v10 = vld [vmem:[#allocation4 + $0x98] sm:$0xff]  ;;  %vm296_vm3 = vcmask 7168  }
  0x28   :  { %v416_v8 = vpack.c.bf16 %v188_v6, %v187_v5  ;;  %v189_v11 = vld [vmem:[#allocation4 + $0x10] sm:$0xff]  ;;  %453 = vrot.lane.b32.xlu0 %v452_v3, %s519_s1  ;;  %v418_v12 = vpack.c.bf16 %v206_v10, %v205_v9  ;;  %v190_v13 = vld [vmem:[#allocation4 + $0x18] sm:$0xff]  ;;  %v207_v14 = vld [vmem:[#allocation4 + $0xa0] sm:$0xff] }
  0x29   :  { %v208_v15 = vld [vmem:[#allocation4 + $0xa8] sm:$0xff]  ;;  %415 = vmatprep.subr.bf16.mxu1 %v414_v7  ;;  %v420_v16 = vpack.c.bf16 %v190_v13, %v189_v11  ;;  %v191_v18 = vld [vmem:[#allocation4 + $0x20] sm:$0xff]  ;;  %v209_v20 = vld [vmem:[#allocation4 + $0xb0] sm:$0xff] }
  0x2a   :  { %417 = vmatpush3.bf16.msra.mxu1 %v416_v8  ;;  %v422_v17 = vpack.c.bf16 %v208_v15, %v207_v14  ;;  %v192_v19 = vld [vmem:[#allocation4 + $0x28] sm:$0xff]  ;;  %v210_v21 = vld [vmem:[#allocation4 + $0xb8] sm:$0xff]  ;;  %v193_v24 = vld [vmem:[#allocation4 + $0x30] sm:$0xff] }
  0x2b   :  { %419 = vmatprep.subr.bf16.mxu1 %v418_v12  ;;  %v424_v22 = vpack.c.bf16 %v192_v19, %v191_v18  ;;  %v426_v23 = vpack.c.bf16 %v210_v21, %v209_v20  ;;  %v194_v25 = vld [vmem:[#allocation4 + $0x38] sm:$0xff]  ;;  %v211_v26 = vld [vmem:[#allocation4 + $0xc0] sm:$0xff]  ;;  %v212_v27 = vld [vmem:[#allocation4 + $0xc8] sm:$0xff] }
  0x2c   :  { %458 = vrot.lane.b32.xlu0 %v452_v3, %s520_s2  ;;  %v101_v28 = vld [vmem:[#allocation2 + $0x80] sm:$0xff]  ;;  %v102_v29 = vld [vmem:[#allocation2 + $0x88] sm:$0xff]  ;;  %v103_v34 = vld [vmem:[#allocation2 + $0x90] sm:$0xff]  ;;  %v428_v35 = vpack.c.bf16 %v194_v25, %v193_v24  ;;  %v430_v40 = vpack.c.bf16 %v212_v27, %v211_v26 }
  0x2d   :  { %v195_v30 = vld [vmem:[#allocation4 + $0x40] sm:$0xff]  ;;  %v382_v31 = vpack.c.bf16 %v102_v29, %v101_v28  ;;  %v86_v33 = vld [vmem:[#allocation2 + $0x8] sm:$0xff]  ;;  %v104_v37 = vld [vmem:[#allocation2 + $0x98] sm:$0xff] }
  0x2e   :  { %421 = vmatpush3.bf16.msra.mxu1 %v420_v16  ;;  %v85_v32 = vld [vmem:[#allocation2] sm:$0xff]  ;;  %v87_v38 = vld [vmem:[#allocation2 + $0x10] sm:$0xff]  ;;  %v88_v39 = vld [vmem:[#allocation2 + $0x18] sm:$0xff]  ;;  %v386_v42 = vpack.c.bf16 %v104_v37, %v103_v34 }
  0x2f   :  { %423 = vmatprep.subr.bf16.mxu1 %v422_v17  ;;  %v384_v36 = vpack.c.bf16 %v86_v33, %v85_v32  ;;  %v196_v41 = vld [vmem:[#allocation4 + $0x48] sm:$0xff]  ;;  %383 = vmatprep.subr.bf16.mxu0 %v382_v31  ;;  %v105_v43 = vld [vmem:[#allocation2 + $0xa0] sm:$0xff]  ;;  %v213_v45 = vld [vmem:[#allocation4 + $0xd0] sm:$0xff]  ;;  %v388_v47 = vpack.c.bf16 %v88_v39, %v87_v38 }
  0x30   :  { %v106_v44 = vld [vmem:[#allocation2 + $0xa8] sm:$0xff]  ;;  %v214_v46 = vld [vmem:[#allocation4 + $0xd8] sm:$0xff]  ;;  %v89_v49 = vld [vmem:[#allocation2 + $0x20] sm:$0xff]  ;;  %v432_v51 = vpack.c.bf16 %v196_v41, %v195_v30 }
  0x31   :  { %385 = vmatpush3.bf16.msra.mxu0 %v384_v36  ;;  %v390_v48 = vpack.c.bf16 %v106_v44, %v105_v43  ;;  %v90_v50 = vld [vmem:[#allocation2 + $0x28] sm:$0xff]  ;;  %v107_v52 = vld [vmem:[#allocation2 + $0xb0] sm:$0xff]  ;;  %v108_v53 = vld [vmem:[#allocation2 + $0xb8] sm:$0xff]  ;;  %v434_v54 = vpack.c.bf16 %v214_v46, %v213_v45 }
  0x32   :  { %425 = vmatpush3.bf16.msra.mxu1 %v424_v22  ;;  %387 = vmatprep.subr.bf16.mxu0 %v386_v42  ;;  %v197_v55 = vld [vmem:[#allocation4 + $0x50] sm:$0xff]  ;;  %v198_v56 = vld [vmem:[#allocation4 + $0x58] sm:$0xff]  ;;  %v215_v57 = vld [vmem:[#allocation4 + $0xe0] sm:$0xff]  ;;  %v392_v59 = vpack.c.bf16 %v90_v50, %v89_v49  ;;  %v394_v60 = vpack.c.bf16 %v108_v53, %v107_v52 }
  0x33   :  { %427 = vmatprep.subr.bf16.mxu1 %v426_v23  ;;  %v216_v58 = vld [vmem:[#allocation4 + $0xe8] sm:$0xff]  ;;  %v91_v61 = vld [vmem:[#allocation2 + $0x30] sm:$0xff]  ;;  %v92_v62 = vld [vmem:[#allocation2 + $0x38] sm:$0xff]  ;;  %v436_v63 = vpack.c.bf16 %v198_v56, %v197_v55 }
  0x34   :  { %v109_v2 = vld [vmem:[#allocation2 + $0xc0] sm:$0xff]  ;;  %v110_v3 = vld [vmem:[#allocation2 + $0xc8] sm:$0xff]  ;;  %v438_v4 = vpack.c.bf16 %v216_v58, %v215_v57  ;;  %v217_v7 = vld [vmem:[#allocation4 + $0xf0] sm:$0xff]  ;;  %v396_v9 = vpack.c.bf16 %v92_v62, %v91_v61 }
  0x35   :  { %389 = vmatpush3.bf16.msra.mxu0 %v388_v47  ;;  %v199_v5 = vld [vmem:[#allocation4 + $0x60] sm:$0xff]  ;;  %v200_v6 = vld [vmem:[#allocation4 + $0x68] sm:$0xff]  ;;  %v218_v8 = vld [vmem:[#allocation4 + $0xf8] sm:$0xff]  ;;  %v398_v10 = vpack.c.bf16 %v110_v3, %v109_v2 }
  0x36   :  { %429 = vmatpush3.bf16.msra.mxu1 %v428_v35  ;;  %391 = vmatprep.subr.bf16.mxu0 %v390_v48  ;;  %v93_v11 = vld [vmem:[#allocation2 + $0x40] sm:$0xff]  ;;  %v94_v12 = vld [vmem:[#allocation2 + $0x48] sm:$0xff]  ;;  %v440_v13 = vpack.c.bf16 %v200_v6, %v199_v5  ;;  %v111_v14 = vld [vmem:[#allocation2 + $0xd0] sm:$0xff]  ;;  %v442_v16 = vpack.c.bf16 %v218_v8, %v217_v7 }
  0x37   :  { %431 = vmatprep.subr.bf16.mxu1 %v430_v40  ;;  %v112_v15 = vld [vmem:[#allocation2 + $0xd8] sm:$0xff]  ;;  %v201_v17 = vld [vmem:[#allocation4 + $0x70] sm:$0xff]  ;;  %v400_v19 = vpack.c.bf16 %v94_v12, %v93_v11  ;;  %v113_v25 = vld [vmem:[#allocation2 + $0xe0] sm:$0xff] }
  0x38   :  { %v202_v18 = vld [vmem:[#allocation4 + $0x78] sm:$0xff]  ;;  %v402_v20 = vpack.c.bf16 %v112_v15, %v111_v14  ;;  %v95_v21 = vld [vmem:[#allocation2 + $0x50] sm:$0xff]  ;;  %v114_v26 = vld [vmem:[#allocation2 + $0xe8] sm:$0xff] }
  0x39   :  { %393 = vmatpush3.bf16.msra.mxu0 %v392_v59  ;;  %v96_v22 = vld [vmem:[#allocation2 + $0x58] sm:$0xff]  ;;  %v444_v23 = vpack.c.bf16 %v202_v18, %v201_v17  ;;  %v406_v27 = vpack.c.bf16 %v114_v26, %v113_v25  ;;  %v97_v28 = vld [vmem:[#allocation2 + $0x60] sm:$0xff]  ;;  %v98_v29 = vld [vmem:[#allocation2 + $0x68] sm:$0xff] }
  0x3a   :  { %433 = vmatpush3.bf16.msra.mxu1 %v432_v51  ;;  %395 = vmatprep.subr.bf16.mxu0 %v394_v60  ;;  %v404_v24 = vpack.c.bf16 %v96_v22, %v95_v21  ;;  %v408_v30 = vpack.c.bf16 %v98_v29, %v97_v28  ;;  %v115_v31 = vld [vmem:[#allocation2 + $0xf0] sm:$0xff]  ;;  %v116_v32 = vld [vmem:[#allocation2 + $0xf8] sm:$0xff] }
  0x3b   :  { %435 = vmatprep.subr.bf16.mxu1 %v434_v54  ;;  %v410_v33 = vpack.c.bf16 %v116_v32, %v115_v31  ;;  %v99_v34 = vld [vmem:[#allocation2 + $0x70] sm:$0xff]  ;;  %v100_v35 = vld [vmem:[#allocation2 + $0x78] sm:$0xff] }
  0x3c   :  { %v412_v36 = vpack.c.bf16 %v100_v35, %v99_v34 }
  0x3d   :  { %397 = vmatpush3.bf16.msra.mxu0 %v396_v9 }
  0x3e   :  { %437 = vmatpush3.bf16.msra.mxu1 %v436_v63  ;;  %399 = vmatprep.subr.bf16.mxu0 %v398_v10 }
  0x3f   :  { %439 = vmatprep.subr.bf16.mxu1 %v438_v4 }
  0x41   :  { %401 = vmatpush3.bf16.msra.mxu0 %v400_v19 }
  0x42   :  { %441 = vmatpush3.bf16.msra.mxu1 %v440_v13  ;;  %403 = vmatprep.subr.bf16.mxu0 %v402_v20 }
  0x43   :  { %443 = vmatprep.subr.bf16.mxu1 %v442_v16 }
  0x45   :  { %405 = vmatpush3.bf16.msra.mxu0 %v404_v24 }
  0x46   :  { %445 = vmatpush3.bf16.msra.mxu1 %v444_v23  ;;  %407 = vmatprep.subr.bf16.mxu0 %v406_v27 }
  0x49   :  { %284 = vmatmul.mubr.f32.vlgmr.msra.gmra.mrb[0].mxu1 %v578_v0  ;;  %409 = vmatpush3.bf16.msra.mxu0 %v408_v30 }
  0x4a   :  { %411 = vmatprep.subr.bf16.mxu0 %v410_v33 }
  0x4d   :  { %413 = vmatpush3.bf16.msra.mxu0 %v412_v36 }
  0x9a   :  { %v454_v37 = vpop.permute.xlu0 %453 }
  0x9b   :  { %v456_v38 = vunpack.i.h.bf16 %v454_v37  ;;  %v455_v39 = vunpack.i.l.bf16 %v454_v37 }
  0x9d   :  { %v64_v40 = vsel %vm63_vm0, %v455_v39, %v456_v38  ;;  %v68_v41 = vsel %vm63_vm0, %v456_v38, %v455_v39 }
  0x9e   :  { %v462_v42 = vpack.i.bf16 %v68_v41, %v64_v40  ;;  %v459_v43 = vpop.permute.xlu0 %458 }
  0x9f   :  { %v461_v44 = vunpack.i.h.bf16 %v459_v43  ;;  %v460_v45 = vunpack.i.l.bf16 %v459_v43 }
  0xa0   :  { %463 = vrot.lane.b32.xlu1 %v462_v42, %s520_s2 }
  0xa1   :  { %v54_v46 = vsel %vm53_vm1, %v460_v45, %v461_v44  ;;  %v58_v47 = vsel %vm53_vm1, %v461_v44, %v460_v45 }
  0xa2   :  { %v80_v51 = vmax.f32 %v583_v1, %v58_v47  ;;  %v79_v52 = vmax.f32 %v578_v0, %v54_v46 }
 0x112   :  { %v464_v48 = vpop.permute.xlu1 %463 }
 0x113   :  { %v466_v49 = vunpack.i.h.bf16 %v464_v48  ;;  %v465_v50 = vunpack.i.l.bf16 %v464_v48 }
 0x115   :  { %v74_v53 = vsel %vm53_vm1, %v465_v50, %v466_v49  ;;  %v78_v54 = vsel %vm53_vm1, %v466_v49, %v465_v50 }
 0x116   :  { %v82_v55 = vmax.f32 %v68_v41, %v78_v54  ;;  %v81_v56 = vmax.f32 %v64_v40, %v74_v53 }
 0x118   :  { %v84_v57 = vmax.f32 %v80_v51, %v82_v55  ;;  %v83_v58 = vmax.f32 %v79_v52, %v81_v56 }
 0x11a   :  { %181 = vmatprep.mubr.f32.mxu0 %v84_v57 }
 0x11b   :  { %182 = vmatmul.mubr.f32.vlgmr.msra.gmra.mrb[0].mxu0 %v83_v58 }
 0x11c   :  { %v379_v59 = vpop.f32.mrb[0].mxu1 }
 0x11d   :  { %v380_v60 = vpop.f32.mrb[1].mxu1 }
 0x11e   :  { %v381_v61 = vadd.f32 %v380_v60, %v379_v59 }
 0x120   :  { %v292_v62 = vsel %vm289_vm2, %v381_v61, 0.0  ;;  %291 = vst.msk [vmem:[%s606_s4] sm:$0xff] %vm289_vm2, %v381_v61 }
 0x121   :  { %293 = vadd.xlane.f32.xlu1 %v292_v62 }
 0x1ae   :  { %v294_v0 = vpop.xlane.xlu1 %293 }
 0x1af   :  { %v295_v1 = vmul.f32 0.015625, %v294_v0 }
 0x1b1   :  { %297 = vst.msk [vmem:[%s607_s5] sm:$0xff] %vm296_vm3, %v295_v1 }
 0x1ee   :  { %v344_v63 = vpop.f32.mrb[0].mxu0 }
 0x1ef   :  { %v345_v2 = vpop.f32.mrb[1].mxu0 }
 0x1f0   :  { %v346_v3 = vadd.f32 %v345_v2, %v344_v63 }
 0x1f2   :  { %290 = vst.msk [vmem:[%s605_s3] sm:$0xff] %vm289_vm2, %v346_v3 }
 0x1f3   :  { %310 = vsyncpa [#allocation3], 1 }
 0x1f4   :  { %311 = vsyncpa [#allocation5], 1 }

</bundles_post_ra>
